<compile_context>
chip_gen: v7x
topology: tpu7x:2x2x1
jax: 0.10.0
libtpu: 0.0.40
codegen_flags: <defaults>
</compile_context>

<pallas_src>
import functools
import math

import jax
import jax.numpy as jnp
from jax.experimental import pallas as pl
from jax.experimental.pallas import tpu as pltpu


_LANE = 128
_BN_EPS = 1e-5


def _round_up(x: int, m: int) -> int:
  return (x + m - 1) // m * m


def _fused_feat_transformer_kernel(x_ref, *refs, n_layers: int, out_pad: int,
                                   vbs: int):
  """All GLU layers applied to one block of virtual-batch chunks.

  x_ref : [rows, in_pad]            padded input block (rows = C * vbs)
  refs  : w_0 .. w_{L-1}            [prev_pad, 2*out_pad] fused value|gate weights (bf16)
          bn                        [2*L, 2*out_pad] f32 (row 2l = gamma_l, 2l+1 = beta_l)
          o_ref                     [rows, out_pad]
  """
  o_ref = refs[-1]
  w_refs = refs[:n_layers]
  bn_ref = refs[n_layers]

  rows = x_ref.shape[0]
  n_chunks = rows // vbs
  two_out = 2 * out_pad
  inv_n = jnp.float32(1.0 / vbs)
  scale = jnp.float32(math.sqrt(0.5))

  gb = bn_ref[...]                      # tiny [2L, 2*out_pad]; load once
  x = x_ref[...].astype(jnp.float32)    # carried activation stays f32

  for l in range(n_layers):
    w = w_refs[l][...]
    # ONE fused matmul per layer (value & gate halves side by side);
    # bf16 operands on the MXU, f32 accumulation.
    h = jnp.dot(x.astype(w.dtype), w, preferred_element_type=jnp.float32)

    # Ghost BatchNorm (training-mode batch stats, biased var, eps=1e-5),
    # single pass sum / sum-of-squares, folded into one h*a + b pass.
    hc = h.reshape(n_chunks, vbs, two_out)
    s = jnp.sum(hc, axis=1, keepdims=True)
    sq = jnp.sum(hc * hc, axis=1, keepdims=True)
    mean = s * inv_n
    var = jnp.maximum(sq * inv_n - mean * mean, 0.0)   # cancellation guard
    gamma = gb[2 * l].reshape(1, 1, two_out)
    beta = gb[2 * l + 1].reshape(1, 1, two_out)
    a = gamma * jax.lax.rsqrt(var + _BN_EPS)
    b = beta - mean * a
    hn = (hc * a + b).reshape(rows, two_out)

    # GLU: value * sigmoid(gate); split falls on a 128-lane boundary.
    out = hn[:, :out_pad] * jax.nn.sigmoid(hn[:, out_pad:])

    if l == 0:
      x = out                       # first layer of a first=True block: no residual
    else:
      x = (x + out) * scale         # x = (x + glu(x)) * sqrt(0.5)

  o_ref[...] = x.astype(o_ref.dtype)


def init_feat_transformer_params(key, input_dim: int, output_dim: int,
                                 n_glu_independent: int = 2,
                                 dtype=jnp.bfloat16):
  """Xavier-normal init mirroring initialize_glu, stored padded & fused.

  Per layer the transposed Linear weight is stored as ONE fused
  [prev_pad, 2*out_pad] matrix (value cols [0:output_dim], gate cols
  [out_pad:out_pad+output_dim]), zero-padded to 128-lane multiples, in
  `dtype` (bf16 by default for native MXU rate).  BN gamma/beta for all
  layers are packed into a single [2*n_layers, 2*out_pad] f32 array.
  """
  in_pad = _round_up(input_dim, _LANE)
  out_pad = _round_up(output_dim, _LANE)

  weights = []
  bn = jnp.zeros((2 * n_glu_independent, 2 * out_pad), jnp.float32)
  in_dim, prev_pad = input_dim, in_pad
  for l in range(n_glu_independent):
    key, kw = jax.random.split(key)
    fan_in, fan_out = in_dim, 2 * output_dim
    gain = math.sqrt((in_dim + 2 * output_dim) / math.sqrt(in_dim))
    std = gain * math.sqrt(2.0 / (fan_in + fan_out))
    w_t = std * jax.random.normal(kw, (in_dim, 2 * output_dim), jnp.float32)

    w = jnp.zeros((prev_pad, 2 * out_pad), dtype)
    w = w.at[:in_dim, :output_dim].set(w_t[:, :output_dim].astype(dtype))
    w = w.at[:in_dim, out_pad:out_pad + output_dim].set(
        w_t[:, output_dim:].astype(dtype))
    weights.append(w)

    bn = bn.at[2 * l, :output_dim].set(1.0)                     # gamma (value)
    bn = bn.at[2 * l, out_pad:out_pad + output_dim].set(1.0)    # gamma (gate)
    # beta rows stay zero.
    in_dim, prev_pad = output_dim, out_pad
  return {"weights": weights, "bn": bn}


def feat_transformer_forward(x, params, *, output_dim: int,
                             virtual_batch_size: int = 256,
                             block_target_bytes: int = 16 << 20):
  """FeatTransformer.forward (shared=Identity, specifics=GLUBlock first=True)."""
  batch, input_dim = x.shape
  vbs = min(virtual_batch_size, batch)
  # TODO(synk): PyTorch GBN's chunk() allows a smaller trailing chunk; this
  # kernel requires batch % virtual_batch_size == 0 for per-chunk BN stats.
  assert batch % vbs == 0, "batch must be a multiple of the virtual batch size"
  n_chunks = batch // vbs

  weights = params["weights"]
  bn = params["bn"]
  n_layers = len(weights)
  in_pad = _round_up(input_dim, _LANE)
  out_pad = _round_up(output_dim, _LANE)
  assert weights[0].shape == (in_pad, 2 * out_pad)

  # --- VMEM budget: physical size differs per generation (128 MiB on
  # v5e/v6e, 64 MiB per TensorCore on v7x) ---------------------------------
  try:
    phys_vmem = int(pltpu.get_tpu_info().vmem_capacity_bytes)
  except Exception:
    phys_vmem = 64 << 20                  # conservative (v7x-sized) fallback
  vmem_budget = int(phys_vmem * 0.75)     # ~96 MiB v5e/v6e, ~48 MiB v7x

  weight_bytes = (sum(w.size * w.dtype.itemsize for w in weights)
                  + bn.size * bn.dtype.itemsize)         # single-buffered
  # Resident bytes per activation row: double-buffered I/O blocks, the
  # carried f32 activation + its bf16 cast, and per-layer f32 temporaries
  # (h and hn at 2*out_pad wide, GLU halves / residual temp).
  m = max(in_pad, out_pad)
  act_bytes_per_row = (2 * 4 * in_pad          # input block x2 buffers
                       + 2 * 4 * out_pad       # output block x2 buffers
                       + 4 * m + 2 * m         # carried f32 + bf16 cast
                       + 2 * 4 * (2 * out_pad)  # h, hn (f32)
                       + 2 * 4 * out_pad)      # GLU halves / residual temp
  act_budget = max(vbs * act_bytes_per_row,
                   vmem_budget - weight_bytes - (4 << 20))
  target = min(block_target_bytes, act_budget)

  # --- choose how many virtual-batch chunks each grid step processes ------
  if vbs % 8 != 0:
    # TODO(synk): non-sublane-aligned virtual batch size: fall back to one
    # full-batch block (correct, but no pipelining / megacore sharding).
    chunks_per_block = n_chunks
  else:
    chunks_per_block = 1
    # Keep n_blocks >= 2 whenever possible so the "parallel" grid axis can
    # shard across v7x's two TensorCores (one extra step is ~0.35us on
    # single-TC v5e/v6e — negligible).
    max_cpb = n_chunks if n_chunks < 2 else n_chunks // 2
    for d in range(1, max_cpb + 1):
      if n_chunks % d == 0 and d * vbs * act_bytes_per_row <= target:
        chunks_per_block = d
  rows_per_block = chunks_per_block * vbs
  n_blocks = n_chunks // chunks_per_block

  # --- pad the input to a lane-dense K -------------------------------------
  xp = x if in_pad == input_dim else jnp.pad(
      x, ((0, 0), (0, in_pad - input_dim)))

  # Weights / BN params have a constant index_map (fetched once, resident for
  # the whole kernel); single-buffer them so they don't pay 2x VMEM.
  def _resident_spec(shape):
    return pl.BlockSpec(shape, lambda i: (0, 0), pipeline_mode=pl.Buffered(1))

  in_specs = [pl.BlockSpec((rows_per_block, in_pad), lambda i: (i, 0))]
  in_specs += [_resident_spec(w.shape) for w in weights]
  in_specs.append(_resident_spec(bn.shape))

  # --- cost estimate + VMEM limit ------------------------------------------
  flops = 0
  prev = in_pad
  for _ in range(n_layers):
    flops += 2 * batch * prev * (2 * out_pad)     # one fused matmul per layer
    prev = out_pad
  transcendentals = n_layers * batch * out_pad    # sigmoid
  bytes_accessed = (xp.size * xp.dtype.itemsize + weight_bytes
                    + batch * out_pad * x.dtype.itemsize)
  cost = pl.CostEstimate(flops=flops, transcendentals=transcendentals,
                         bytes_accessed=bytes_accessed)

  vmem_est = weight_bytes + rows_per_block * act_bytes_per_row
  vmem_limit = int(min(vmem_budget, max(32 << 20, 2 * vmem_est)))

  kernel = functools.partial(_fused_feat_transformer_kernel,
                             n_layers=n_layers, out_pad=out_pad, vbs=vbs)

  out_padded = pl.pallas_call(
      kernel,
      out_shape=jax.ShapeDtypeStruct((batch, out_pad), x.dtype),
      grid=(n_blocks,),
      in_specs=in_specs,
      out_specs=pl.BlockSpec((rows_per_block, out_pad), lambda i: (i, 0)),
      compiler_params=pltpu.CompilerParams(
          dimension_semantics=("parallel",),
          vmem_limit_bytes=vmem_limit),
      cost_estimate=cost,
  )(xp, *weights, bn)

  # Strip the lane padding (padded columns are exactly zero by construction).
  return out_padded[:, :output_dim]


def feat_transformer_reference(x, params, *, output_dim: int,
                               virtual_batch_size: int):
  """Pure-JAX reference mirroring the kernel math (bf16 matmul operands)."""
  weights = params["weights"]
  bn = params["bn"]
  out_pad = weights[0].shape[1] // 2
  batch, input_dim = x.shape
  vbs = min(virtual_batch_size, batch)
  n_chunks = batch // vbs
  scale = math.sqrt(0.5)

  def gbn(h, gamma, beta):
    hc = h.reshape(n_chunks, vbs, output_dim)
    mean = jnp.mean(hc, axis=1, keepdims=True)
    var = jnp.mean((hc - mean) ** 2, axis=1, keepdims=True)
    hn = (hc - mean) * jax.lax.rsqrt(var + _BN_EPS) * gamma + beta
    return hn.reshape(batch, output_dim)

  h = x
  in_dim = input_dim
  for l, w in enumerate(weights):
    wv = w[:in_dim, :output_dim].astype(jnp.float32)
    wg = w[:in_dim, out_pad:out_pad + output_dim].astype(jnp.float32)
    gv = bn[2 * l, :output_dim]
    gg = bn[2 * l, out_pad:out_pad + output_dim]
    bv = bn[2 * l + 1, :output_dim]
    bg = bn[2 * l + 1, out_pad:out_pad + output_dim]
    hin = h.astype(jnp.bfloat16).astype(jnp.float32)
    v = gbn(hin @ wv, gv, bv)
    g = gbn(hin @ wg, gg, bg)
    out = v * jax.nn.sigmoid(g)
    h = out if l == 0 else (h + out) * scale
    in_dim = output_dim
  return h


if __name__ == "__main__":
  key = jax.random.PRNGKey(0)
  batch = 16
  input_dim = 16
  output_dim = 8
  virtual_batch_size = 8     # two ghost-BN chunks -> two grid blocks
  n_glu_independent = 2

  kx, kp = jax.random.split(key)
  x = jax.random.normal(kx, (batch, input_dim), jnp.float32)
  params = init_feat_transformer_params(kp, input_dim, output_dim,
                                        n_glu_independent)

  out = feat_transformer_forward(x, params, output_dim=output_dim,
                                 virtual_batch_size=virtual_batch_size)
  out = jax.block_until_ready(out)
  assert out.shape == (batch, output_dim)
  assert bool(jnp.all(jnp.isfinite(out)))

  ref = feat_transformer_reference(x, params, output_dim=output_dim,
                                   virtual_batch_size=virtual_batch_size)
  ref = jax.block_until_ready(ref)
  assert bool(jnp.allclose(out, ref, rtol=5e-2, atol=1e-2)), (
      float(jnp.max(jnp.abs(out - ref))))
  print("KERNEL_OK")
</pallas_src>

<mosaic_0001>
module attributes {stable_mosaic.version = 11 : i64} {
  func.func @_fused_feat_transformer_kernel(%arg0: i32, %arg1: memref<8x128xf32, #tpu.memory_space<vmem>>, %arg2: memref<128x256xbf16, #tpu.memory_space<vmem>>, %arg3: memref<128x256xbf16, #tpu.memory_space<vmem>>, %arg4: memref<4x256xf32, #tpu.memory_space<vmem>>, %arg5: memref<8x128xf32, #tpu.memory_space<vmem>>) attributes {dimension_semantics = [#tpu.dimension_semantics<parallel>], iteration_bounds = array<i64: 2>, scalar_prefetch = 0 : i64, scratch_operands = 0 : i64, tpu.core_type = #tpu.core_type<tc>, window_params = [{transform_indices = @transform_0, window_bounds = array<i64: 8, 128>}, {pipeline_mode = #tpu.pipeline_mode<synchronous>, transform_indices = @transform_1, window_bounds = array<i64: 128, 256>}, {pipeline_mode = #tpu.pipeline_mode<synchronous>, transform_indices = @transform_2, window_bounds = array<i64: 128, 256>}, {pipeline_mode = #tpu.pipeline_mode<synchronous>, transform_indices = @transform_3, window_bounds = array<i64: 4, 256>}, {transform_indices = @transform_4, window_bounds = array<i64: 8, 128>}]} {
    %c0 = arith.constant 0 : index
    %c0_0 = arith.constant 0 : index
    %0 = vector.load %arg4[%c0, %c0_0] : memref<4x256xf32, #tpu.memory_space<vmem>>, vector<4x256xf32>
    %c0_1 = arith.constant 0 : index
    %c0_2 = arith.constant 0 : index
    %1 = vector.load %arg1[%c0_1, %c0_2] : memref<8x128xf32, #tpu.memory_space<vmem>>, vector<8x128xf32>
    %c0_3 = arith.constant 0 : index
    %c0_4 = arith.constant 0 : index
    %2 = vector.load %arg2[%c0_3, %c0_4] : memref<128x256xbf16, #tpu.memory_space<vmem>>, vector<128x256xbf16>
    %3 = arith.truncf %1 : vector<8x128xf32> to vector<8x128xbf16>
    %cst = arith.constant dense<0.000000e+00> : vector<8x256xf32>
    %4 = tpu.matmul %3, %2, %cst {dimension_numbers = #tpu.dot_dimension_numbers<[1], [0], [0], [1], [0, 0, 1, 1], [], []>} : vector<8x128xbf16>, vector<128x256xbf16>, vector<8x256xf32> -> vector<8x256xf32>
    %5 = vector.shape_cast %4 : vector<8x256xf32> to vector<1x8x256xf32>
    %cst_5 = arith.constant dense<0.000000e+00> : vector<1x256xf32>
    %6 = vector.multi_reduction <add>, %5, %cst_5 [1] : vector<1x8x256xf32> to vector<1x256xf32>
    %7 = vector.shape_cast %6 : vector<1x256xf32> to vector<1x1x256xf32>
    %8 = arith.mulf %5, %5 : vector<1x8x256xf32>
    %cst_6 = arith.constant dense<0.000000e+00> : vector<1x256xf32>
    %9 = vector.multi_reduction <add>, %8, %cst_6 [1] : vector<1x8x256xf32> to vector<1x256xf32>
    %10 = vector.shape_cast %9 : vector<1x256xf32> to vector<1x1x256xf32>
    %cst_7 = arith.constant 1.250000e-01 : f32
    %11 = vector.broadcast %cst_7 : f32 to vector<1x1x256xf32>
    %12 = arith.mulf %7, %11 : vector<1x1x256xf32>
    %cst_8 = arith.constant 1.250000e-01 : f32
    %13 = vector.broadcast %cst_8 : f32 to vector<1x1x256xf32>
    %14 = arith.mulf %10, %13 : vector<1x1x256xf32>
    %15 = arith.mulf %12, %12 : vector<1x1x256xf32>
    %16 = arith.subf %14, %15 : vector<1x1x256xf32>
    %cst_9 = arith.constant 0.000000e+00 : f32
    %17 = vector.broadcast %cst_9 : f32 to vector<1x1x256xf32>
    %18 = arith.maximumf %16, %17 : vector<1x1x256xf32>
    %19 = vector.extract_strided_slice %0 {offsets = [0, 0], sizes = [1, 256], strides = [1, 1]} : vector<4x256xf32> to vector<1x256xf32>
    %20 = vector.shape_cast %19 : vector<1x256xf32> to vector<256xf32>
    %21 = vector.shape_cast %20 : vector<256xf32> to vector<1x1x256xf32>
    %22 = vector.extract_strided_slice %0 {offsets = [1, 0], sizes = [1, 256], strides = [1, 1]} : vector<4x256xf32> to vector<1x256xf32>
    %23 = vector.shape_cast %22 : vector<1x256xf32> to vector<256xf32>
    %24 = vector.shape_cast %23 : vector<256xf32> to vector<1x1x256xf32>
    %cst_10 = arith.constant 9.99999974E-6 : f32
    %25 = vector.broadcast %cst_10 : f32 to vector<1x1x256xf32>
    %26 = arith.addf %18, %25 : vector<1x1x256xf32>
    %27 = math.rsqrt %26 : vector<1x1x256xf32>
    %28 = arith.mulf %21, %27 : vector<1x1x256xf32>
    %29 = arith.mulf %12, %28 : vector<1x1x256xf32>
    %30 = arith.subf %24, %29 : vector<1x1x256xf32>
    %31 = vector.broadcast %28 : vector<1x1x256xf32> to vector<1x8x256xf32>
    %32 = arith.mulf %5, %31 : vector<1x8x256xf32>
    %33 = vector.broadcast %30 : vector<1x1x256xf32> to vector<1x8x256xf32>
    %34 = arith.addf %32, %33 : vector<1x8x256xf32>
    %35 = vector.shape_cast %34 : vector<1x8x256xf32> to vector<8x256xf32>
    %36 = vector.extract_strided_slice %35 {offsets = [0, 0], sizes = [8, 128], strides = [1, 1]} : vector<8x256xf32> to vector<8x128xf32>
    %37 = vector.extract_strided_slice %35 {offsets = [0, 128], sizes = [8, 128], strides = [1, 1]} : vector<8x256xf32> to vector<8x128xf32>
    %38 = arith.negf %37 : vector<8x128xf32>
    %39 = math.exp %38 : vector<8x128xf32>
    %cst_11 = arith.constant 1.000000e+00 : f32
    %40 = vector.broadcast %cst_11 : f32 to vector<8x128xf32>
    %41 = arith.addf %40, %39 : vector<8x128xf32>
    %42 = arith.divf %40, %41 : vector<8x128xf32>
    %43 = arith.mulf %36, %42 : vector<8x128xf32>
    %c0_12 = arith.constant 0 : index
    %c0_13 = arith.constant 0 : index
    %44 = vector.load %arg3[%c0_12, %c0_13] : memref<128x256xbf16, #tpu.memory_space<vmem>>, vector<128x256xbf16>
    %45 = arith.truncf %43 : vector<8x128xf32> to vector<8x128xbf16>
    %cst_14 = arith.constant dense<0.000000e+00> : vector<8x256xf32>
    %46 = tpu.matmul %45, %44, %cst_14 {dimension_numbers = #tpu.dot_dimension_numbers<[1], [0], [0], [1], [0, 0, 1, 1], [], []>} : vector<8x128xbf16>, vector<128x256xbf16>, vector<8x256xf32> -> vector<8x256xf32>
    %47 = vector.shape_cast %46 : vector<8x256xf32> to vector<1x8x256xf32>
    %cst_15 = arith.constant dense<0.000000e+00> : vector<1x256xf32>
    %48 = vector.multi_reduction <add>, %47, %cst_15 [1] : vector<1x8x256xf32> to vector<1x256xf32>
    %49 = vector.shape_cast %48 : vector<1x256xf32> to vector<1x1x256xf32>
    %50 = arith.mulf %47, %47 : vector<1x8x256xf32>
    %cst_16 = arith.constant dense<0.000000e+00> : vector<1x256xf32>
    %51 = vector.multi_reduction <add>, %50, %cst_16 [1] : vector<1x8x256xf32> to vector<1x256xf32>
    %52 = vector.shape_cast %51 : vector<1x256xf32> to vector<1x1x256xf32>
    %cst_17 = arith.constant 1.250000e-01 : f32
    %53 = vector.broadcast %cst_17 : f32 to vector<1x1x256xf32>
    %54 = arith.mulf %49, %53 : vector<1x1x256xf32>
    %cst_18 = arith.constant 1.250000e-01 : f32
    %55 = vector.broadcast %cst_18 : f32 to vector<1x1x256xf32>
    %56 = arith.mulf %52, %55 : vector<1x1x256xf32>
    %57 = arith.mulf %54, %54 : vector<1x1x256xf32>
    %58 = arith.subf %56, %57 : vector<1x1x256xf32>
    %cst_19 = arith.constant 0.000000e+00 : f32
    %59 = vector.broadcast %cst_19 : f32 to vector<1x1x256xf32>
    %60 = arith.maximumf %58, %59 : vector<1x1x256xf32>
    %61 = vector.extract_strided_slice %0 {offsets = [2, 0], sizes = [1, 256], strides = [1, 1]} : vector<4x256xf32> to vector<1x256xf32>
    %62 = vector.shape_cast %61 : vector<1x256xf32> to vector<256xf32>
    %63 = vector.shape_cast %62 : vector<256xf32> to vector<1x1x256xf32>
    %64 = vector.extract_strided_slice %0 {offsets = [3, 0], sizes = [1, 256], strides = [1, 1]} : vector<4x256xf32> to vector<1x256xf32>
    %65 = vector.shape_cast %64 : vector<1x256xf32> to vector<256xf32>
    %66 = vector.shape_cast %65 : vector<256xf32> to vector<1x1x256xf32>
    %cst_20 = arith.constant 9.99999974E-6 : f32
    %67 = vector.broadcast %cst_20 : f32 to vector<1x1x256xf32>
    %68 = arith.addf %60, %67 : vector<1x1x256xf32>
    %69 = math.rsqrt %68 : vector<1x1x256xf32>
    %70 = arith.mulf %63, %69 : vector<1x1x256xf32>
    %71 = arith.mulf %54, %70 : vector<1x1x256xf32>
    %72 = arith.subf %66, %71 : vector<1x1x256xf32>
    %73 = vector.broadcast %70 : vector<1x1x256xf32> to vector<1x8x256xf32>
    %74 = arith.mulf %47, %73 : vector<1x8x256xf32>
    %75 = vector.broadcast %72 : vector<1x1x256xf32> to vector<1x8x256xf32>
    %76 = arith.addf %74, %75 : vector<1x8x256xf32>
    %77 = vector.shape_cast %76 : vector<1x8x256xf32> to vector<8x256xf32>
    %78 = vector.extract_strided_slice %77 {offsets = [0, 0], sizes = [8, 128], strides = [1, 1]} : vector<8x256xf32> to vector<8x128xf32>
    %79 = vector.extract_strided_slice %77 {offsets = [0, 128], sizes = [8, 128], strides = [1, 1]} : vector<8x256xf32> to vector<8x128xf32>
    %80 = arith.negf %79 : vector<8x128xf32>
    %81 = math.exp %80 : vector<8x128xf32>
    %cst_21 = arith.constant 1.000000e+00 : f32
    %82 = vector.broadcast %cst_21 : f32 to vector<8x128xf32>
    %83 = arith.addf %82, %81 : vector<8x128xf32>
    %84 = arith.divf %82, %83 : vector<8x128xf32>
    %85 = arith.mulf %78, %84 : vector<8x128xf32>
    %86 = arith.addf %43, %85 : vector<8x128xf32>
    %cst_22 = arith.constant 0.707106769 : f32
    %87 = vector.broadcast %cst_22 : f32 to vector<8x128xf32>
    %88 = arith.mulf %86, %87 : vector<8x128xf32>
    %c0_23 = arith.constant 0 : index
    %c0_24 = arith.constant 0 : index
    %89 = vector.load %arg5[%c0_23, %c0_24] : memref<8x128xf32, #tpu.memory_space<vmem>>, vector<8x128xf32>
    tpu.vector_store %arg5[%c0_23, %c0_24], %88 {strides = array<i32>} : memref<8x128xf32, #tpu.memory_space<vmem>>, vector<8x128xf32>,
    return
  }
  func.func @transform_0(%arg0: i32) -> (i32, i32) {
    %c0_i32 = arith.constant 0 : i32
    %c0_i32_0 = arith.constant 0 : i32
    return %arg0, %c0_i32 : i32, i32
  }
  func.func @transform_1(%arg0: i32) -> (i32, i32) {
    %c0_i32 = arith.constant 0 : i32
    %c0_i32_0 = arith.constant 0 : i32
    %c0_i32_1 = arith.constant 0 : i32
    return %c0_i32, %c0_i32_0 : i32, i32
  }
  func.func @transform_2(%arg0: i32) -> (i32, i32) {
    %c0_i32 = arith.constant 0 : i32
    %c0_i32_0 = arith.constant 0 : i32
    %c0_i32_1 = arith.constant 0 : i32
    return %c0_i32, %c0_i32_0 : i32, i32
  }
  func.func @transform_3(%arg0: i32) -> (i32, i32) {
    %c0_i32 = arith.constant 0 : i32
    %c0_i32_0 = arith.constant 0 : i32
    %c0_i32_1 = arith.constant 0 : i32
    return %c0_i32, %c0_i32_0 : i32, i32
  }
  func.func @transform_4(%arg0: i32) -> (i32, i32) {
    %c0_i32 = arith.constant 0 : i32
    %c0_i32_0 = arith.constant 0 : i32
    return %arg0, %c0_i32 : i32, i32
  }
}

</mosaic_0001>

<bundles_post_ra>
// kernel: tpu_custom_call.1
= control target key start
LH: loop header
LB: loop body
LE: loop exit
PB: predicated region body
PF: predicated region fallthrough
CT: control target
= control target key end

     0   :  { %9 = vsyncpa [#allocation3], 0  ;;  %s1466_s0 = inlined_call_operand.hbm [shape: f32[16,128], index: 0, kind: input, shape index: {}]   ;;  %s1467_s1 = inlined_call_operand.hbm [shape: bf16[128,256], index: 1, kind: input, shape index: {}]   ;;  %s1468_s2 = inlined_call_operand.hbm [shape: bf16[128,256], index: 2, kind: input, shape index: {}]   ;;  %s1469_s3 = inlined_call_operand.vmem [shape: f32[4,256], index: 3, kind: input, shape index: {}]   ;;  %s1470_s4 = inlined_call_operand.hbm [shape: f32[16,128], index: 4, kind: output, shape index: {}]  }
   0x1   :  { %11 = vsyncpa [#allocation3 + $0x1], 0 }
   0x2   :  { %12 = vsyncpa [#allocation6], 0 }
   0x3   :  { %13 = vsyncpa [#allocation4], 0 }
   0x4   :  { %15 = vsyncpa [#allocation4 + $0x1], 0  ;;  %s1206_s15 = smov 0   ;;  %s1208_s16 = smov 0  }
   0x5   :  { %s1210_s17 = smov 0   ;;  %s1212_s18 = smov 0  }
   0x6 LB: > { %s1227_s19 = sadd.s32 4294967295, %s1172_s18   ;;  %s832_s20 = sadd.s32 4294967294, %s1172_s18   ;;  %s1172_s18 = sphi %s1212_s18, %s1490_s18   ;;  %s1168_s17 = sphi %s1210_s17, %s1489_s17   ;;  %s1164_s16 = sphi %s1208_s16, %s1488_s16   ;;  %s1160_s15 = sphi %s1206_s15, %s1487_s15  }
   0x7   : > { %p41_p0 = scmp.ne.s32.totalorder %s1164_s16, %s1160_s15  ;;  %p1471_p1 = scmp.eq.s32.totalorder %s1227_s19, 0 }
   0x8   : > { %p134_p3 = scmp.eq.s32.totalorder %s832_s20, 1  ;;  %p833_p5 = scmp.ge.s32.totalorder %s1172_s18, 1 }
   0x9   : > { %p1236_p4 = por %p1471_p1, %p41_p0  ;;  %p141_p7 = scmp.lt.s32.totalorder %s1172_s18, 3 }
   0xa   : > { %p1241_p6 = por %p134_p3, %p41_p0  ;;  %s1174_s24 = smov [#allocation5]  }
   0xb   : > { %s1474_s21 = scalar_select %p1236_p4, 1, 0 }
   0xc   : > { %s1475_s22 = scalar_select %p1241_p6, 1, 0 }
   0xd   : > { %p1246_p8 = pnand %p833_p5, %p141_p7  ;;  %s153_s25 = sshll.u32 %s1174_s24, 4  ;;  %s1250_s25 = int_to_ptr.vmem [resolvable:$true] %s153_s25 }
   0xe   : > { %s1175_s27 = smov [#allocation7]   ;;  %s1016_s5 = scalar_lea.hbm %s1467_s1, 2048 }
   0xf   : > { %p894_p9 = pneg %p1246_p8  ;;  %s166_s28 = sshll.u32 %s1175_s27, 4  ;;  %s1261_s28 = int_to_ptr.vmem [resolvable:$true] %s166_s28 }
  0x10   : > { %p1017_p12 = scmp.ne.s32.totalorder %s1467_s1, %s1016_s5  ;;  %p1023_p5 = scmp.lt.u32.totalorder %s1016_s5, %s1467_s1 }
  0x11   : > { %p1257_p11 = pnand %p894_p9, %p1471_p1 }
  0x13   : > { %p1018_p13 = pneg %p1257_p11 }
  0x15   : > { %p1019_p0 = pnand %p1018_p13, %p1017_p12 }
  0x17   : > { %p1020_p3 = pneg %p1019_p0 }
  0x19   : > { %p1025_p7 = pnand %p1023_p5, %p1020_p3 }
  0x1b   : > { %1028 = shalt.err (!%p1025_p7)
}
  0x1c   : > { %s1029_s10 = scalar_lea.vmem %s1250_s25, 2048  ;;  %p1037_p2 = scmp.lt.s32.totalorder %s1250_s25, %s1250_s25 }
  0x1d   : > { %p1030_p9 = scmp.ne.s32.totalorder %s1250_s25, %s1029_s10  ;;  %p1038_p12 = scmp.lt.s32.totalorder %s1029_s10, %s1029_s10 }
  0x1f   : > { %p1032_p10 = pnand %p1030_p9, %p1018_p13  ;;  %p1039_p0 = por %p1038_p12, %p1037_p2 }
  0x21   : > { %p1033_p1 = pneg %p1032_p10 }
  0x23   : > { %p1040_p6 = pnand %p1039_p0, %p1033_p1 }
  0x25   : > { %1043 = shalt.err (!%p1040_p6)
}
  0x26   : > { %s1176_s11 = smov 128   ;;  %s1177_s12 = smov 8  }
  0x27   : > { %897 = dma.hbm_to_vmem [thread:$0]  (!%p1257_p11), %s1467_s1, 2048, %s1250_s25, [#allocation6], %s1176_s11, %s1176_s11, %s1177_s12  }
  0x28   : > { %s1044_s27 = scalar_lea.hbm %s1468_s2, 2048 }
  0x29   : > { %p1045_p2 = scmp.ne.s32.totalorder %s1468_s2, %s1044_s27  ;;  %p1051_p10 = scmp.lt.u32.totalorder %s1044_s27, %s1468_s2 }
  0x2b   : > { %p1047_p1 = pnand %p1045_p2, %p1018_p13 }
  0x2d   : > { %p1048_p6 = pneg %p1047_p1 }
  0x2f   : > { %p1053_p3 = pnand %p1051_p10, %p1048_p6 }
  0x31   : > { %1056 = shalt.err (!%p1053_p3)
}
  0x32   : > { %s1057_s25 = scalar_lea.vmem %s1261_s28, 2048  ;;  %p1065_p12 = scmp.lt.s32.totalorder %s1261_s28, %s1261_s28 }
  0x33   : > { %p1058_p5 = scmp.ne.s32.totalorder %s1261_s28, %s1057_s25  ;;  %p1066_p0 = scmp.lt.s32.totalorder %s1057_s25, %s1057_s25 }
  0x35   : > { %p1060_p7 = pnand %p1058_p5, %p1018_p13  ;;  %p1067_p2 = por %p1066_p0, %p1065_p12 }
  0x37   : > { %p1061_p9 = pneg %p1060_p7 }
  0x39   : > { %p1068_p1 = pnand %p1067_p2, %p1061_p9 }
  0x3b   : > { %1071 = shalt.err (!%p1068_p1)
}
  0x3c   : > { %900 = dma.hbm_to_vmem [thread:$0]  (!%p1257_p11), %s1468_s2, 2048, %s1261_s28, [#allocation6], %s1176_s11, %s1176_s11, %s1177_s12  }
  0x3d   : > { %s1316_s9 = sadd.s32 1, %s1172_s18   ;;  %s28_s26 = sadd.s32 1, %s1168_s17 }
  0x3e   : > { %s25_s10 = ssub.s32 %s1172_s18, %s1316_s9  ;;  %p35_p13 = scmp.ne.s32.totalorder %s1168_s17, %s1164_s16 }
  0x3f   : > { %p26_p6 = scmp.eq.s32.totalorder %s25_s10, 0  ;;  %p36_p10 = scmp.eq.s32.totalorder %s1172_s18, 0 }
  0x40   : > { %p1478_p3 = scmp.eq.s32.totalorder %s1227_s19, 1  ;;  %p911_p7 = scmp.lt.s32.totalorder %s1172_s18, 2 }
  0x41   : > { %s1332_s14 = scalar_select %p26_p6, %s1168_s17, %s28_s26  }
  0x42   : > { %p1326_p5 = por %p1478_p3, %p35_p13  ;;  %p37_p9 = por %p36_p10, %p35_p13 }
  0x43   : > { %s183_s20 = sand.u32 1, %s1168_s17   ;;  %s838_s28 = sshll.u32 %s1172_s18, 7 }
  0x44   : > { %s1479_s13 = scalar_select %p1326_p5, 1, 0 }
  0x45   : > { %s837_s24 = sshll.u32 %s183_s20, 3  ;;  %s1339_s27 = scalar_lea.hbm %s1466_s0, %s838_s28 }
  0x46   : > { %s187_s29 = scalar_lea.vmem [#allocation2], %s837_s24  ;;  %p1343_p11 = pnand %p911_p7, %p37_p9 }
  0x47   : > { %s194_s30 = sshll.u32 %s187_s29, 4  ;;  %s184_s6 = scalar_lea.sflag [#allocation3], %s183_s20  ;;  %s1341_s30 = int_to_ptr.vmem [resolvable:$true] %s194_s30 }
  0x48   : > { %s1072_s25 = scalar_lea.hbm %s1339_s27, 128  ;;  %p1074_p0 = pneg %p1343_p11 }
  0x49   : > { %p1073_p12 = scmp.ne.s32.totalorder %s1339_s27, %s1072_s25  ;;  %s1077_s26 = scalar_lea.hbm %s1466_s0, 256 }
  0x4a   : > { %p1078_p13 = scmp.lt.u32.totalorder %s1339_s27, %s1466_s0  ;;  %p1079_p6 = scmp.lt.u32.totalorder %s1077_s26, %s1072_s25 }
  0x4b   : > { %p1075_p2 = pnand %p1074_p0, %p1073_p12  ;;  %p1081_p3 = scmp.lt.u32.totalorder %s1072_s25, %s1339_s27 }
  0x4c   : > { %p1080_p10 = por %p1079_p6, %p1078_p13 }
  0x4d   : > { %p1076_p1 = pneg %p1075_p2 }
  0x4e   : > { %p1082_p7 = por %p1081_p3, %p1080_p10 }
  0x50   : > { %p1083_p9 = pnand %p1082_p7, %p1076_p1 }
  0x52   : > { %1086 = shalt.err (!%p1083_p9)
}
  0x53   : > { %s1087_s20 = scalar_lea.vmem %s1341_s30, 128  ;;  %s1178_s28 = smov [#allocation2]  }
  0x54   : > { %p1088_p12 = scmp.ne.s32.totalorder %s1341_s30, %s1087_s20  ;;  %s1092_s11 = sshll.u32 %s1178_s28, 4  ;;  %s1093_s11 = int_to_ptr.vmem [resolvable:$false] %s1092_s11 }
  0x55   : > { %s1094_s12 = scalar_lea.vmem %s1093_s11, 256  ;;  %p1095_p4 = scmp.lt.s32.totalorder %s1341_s30, %s1093_s11 }
  0x56   : > { %p1090_p2 = pnand %p1088_p12, %p1074_p0  ;;  %p1096_p13 = scmp.lt.s32.totalorder %s1094_s12, %s1087_s20 }
  0x58   : > { %p1091_p5 = pneg %p1090_p2  ;;  %p1097_p6 = por %p1096_p13, %p1095_p4 }
  0x5a   : > { %p1098_p10 = pnand %p1097_p6, %p1091_p5 }
  0x5c   : > { %1101 = shalt.err (!%p1098_p10)
}
  0x5d   : > { %904 = dma.hbm_to_vmem [thread:$0]  (!%p1343_p11), %s1339_s27, 128, %s1341_s30, %s184_s6  }
  0x5e   : > { %203 = sbr.rel (%p1246_p8) target bundleno = 749 (0x2ed), region = 36  ;;  %s1375_s29 = sand.u32 (!%p1246_p8), 1, %s1164_s16  }
  0x5f   : > { %s840_s25 = sshll.u32 (!%p1246_p8), %s1375_s29, 3  ;;  %s206_s7 = scalar_lea.sflag (!%p1246_p8), [#allocation3], %s1375_s29 }
  0x60   : > { %s1381_s8 = scalar_lea.vmem (!%p1246_p8), [#allocation2], %s840_s25  ;;  %p1481_p4 = scmp.ne.s32.totalorder (!%p1246_p8), %s1474_s21, 0 }
  0x65   : > { %1147 = dma.done.wait (%p1481_p4), %s206_s7, 128  }
  0x66   : > { %1149 = vsyncadd (%p1481_p4), %s206_s7, 4294967168  ;;  %p1482_p5 = scmp.eq.s32.totalorder %s1227_s19, 0 }
  0x68   : > { %1151 = dma.done.wait (%p1482_p5), [#allocation6], 4096   ;;  %p1483_p8 = pmov %p1482_p5 }
  0x69   : > { %v1179_v0 = vmov 0   ;;  %v952_v1 = vld [vmem:[#allocation5 + $0x4] ss:$8 sps:$4 sm:$0xff]   ;;  %v954_v2 = vld [vmem:[#allocation5] ss:$8 sps:$4 sm:$0xff]   ;;  %v244_v17 = vld [vmem:[%s1381_s8] sm:$0xff] }
  0x6a   : > { %1153 = vsyncadd (%p1483_p8), [#allocation6], 4294963200  ;;  %374 = vmatprep.mubr.bf16.mxu0 %v1179_v0  ;;  %614 = vmatprep.mubr.bf16.mxu1 %v1179_v0  ;;  %v955_v3 = vld [vmem:[#allocation5 + $0x14] ss:$8 sps:$4 sm:$0xff]   ;;  %v957_v4 = vld [vmem:[#allocation5 + $0x10] ss:$8 sps:$4 sm:$0xff]   ;;  %v261_v18 = vpack.c.bf16 %v244_v17, %v244_v17 }
  0x6b   : > { %342 = vmatprep.subr.bf16.mxu0 %v952_v1  ;;  %v958_v5 = vld [vmem:[#allocation5 + $0x24] ss:$8 sps:$4 sm:$0xff]   ;;  %v960_v6 = vld [vmem:[#allocation5 + $0x20] ss:$8 sps:$4 sm:$0xff]   ;;  %v961_v7 = vld [vmem:[#allocation5 + $0x34] ss:$8 sps:$4 sm:$0xff]  }
  0x6c   : > { %343 = vmatpush1.bf16.msra.mxu0 %v954_v2  ;;  %v963_v8 = vld [vmem:[#allocation5 + $0x30] ss:$8 sps:$4 sm:$0xff]   ;;  %v964_v9 = vld [vmem:[#allocation5 + $0x44] ss:$8 sps:$4 sm:$0xff]   ;;  %v966_v10 = vld [vmem:[#allocation5 + $0x40] ss:$8 sps:$4 sm:$0xff]  }
  0x6d   : > { %344 = vmatprep.subr.bf16.mxu0 %v955_v3  ;;  %v967_v11 = vld [vmem:[#allocation5 + $0x54] ss:$8 sps:$4 sm:$0xff]   ;;  %v969_v12 = vld [vmem:[#allocation5 + $0x50] ss:$8 sps:$4 sm:$0xff]   ;;  %v970_v13 = vld [vmem:[#allocation5 + $0x64] ss:$8 sps:$4 sm:$0xff]  }
  0x6e   : > { %v972_v14 = vld [vmem:[#allocation5 + $0x60] ss:$8 sps:$4 sm:$0xff]   ;;  %v973_v15 = vld [vmem:[#allocation5 + $0x74] ss:$8 sps:$4 sm:$0xff]   ;;  %v975_v16 = vld [vmem:[#allocation5 + $0x70] ss:$8 sps:$4 sm:$0xff]  }
  0x6f   : > { %v976_v19 = vld [vmem:[#allocation7 + $0x4] ss:$8 sps:$4 sm:$0xff]   ;;  %v978_v20 = vld [vmem:[#allocation7] ss:$8 sps:$4 sm:$0xff]   ;;  %v979_v21 = vld [vmem:[#allocation7 + $0x14] ss:$8 sps:$4 sm:$0xff]  }
  0x70   : > { %345 = vmatpush1.bf16.msra.mxu0 %v957_v4  ;;  %582 = vmatprep.subr.bf16.mxu1 %v976_v19  ;;  %v981_v22 = vld [vmem:[#allocation7 + $0x10] ss:$8 sps:$4 sm:$0xff]   ;;  %v982_v23 = vld [vmem:[#allocation7 + $0x24] ss:$8 sps:$4 sm:$0xff]   ;;  %v984_v24 = vld [vmem:[#allocation7 + $0x20] ss:$8 sps:$4 sm:$0xff]  }
  0x71   : > { %346 = vmatprep.subr.bf16.mxu0 %v958_v5  ;;  %583 = vmatpush1.bf16.msra.mxu1 %v978_v20  ;;  %v985_v25 = vld [vmem:[#allocation7 + $0x34] ss:$8 sps:$4 sm:$0xff]   ;;  %v987_v26 = vld [vmem:[#allocation7 + $0x30] ss:$8 sps:$4 sm:$0xff]   ;;  %v988_v27 = vld [vmem:[#allocation7 + $0x44] ss:$8 sps:$4 sm:$0xff]  }
  0x72   : > { %584 = vmatprep.subr.bf16.mxu1 %v979_v21  ;;  %v990_v28 = vld [vmem:[#allocation7 + $0x40] ss:$8 sps:$4 sm:$0xff]   ;;  %v991_v29 = vld [vmem:[#allocation7 + $0x54] ss:$8 sps:$4 sm:$0xff]   ;;  %v993_v30 = vld [vmem:[#allocation7 + $0x50] ss:$8 sps:$4 sm:$0xff]  }
  0x73   : > { %v994_v31 = vld [vmem:[#allocation7 + $0x64] ss:$8 sps:$4 sm:$0xff]   ;;  %v996_v32 = vld [vmem:[#allocation7 + $0x60] ss:$8 sps:$4 sm:$0xff]   ;;  %v997_v33 = vld [vmem:[#allocation7 + $0x74] ss:$8 sps:$4 sm:$0xff]  }
  0x74   : > { %347 = vmatpush1.bf16.msra.mxu0 %v960_v6  ;;  %v999_v34 = vld [vmem:[#allocation7 + $0x70] ss:$8 sps:$4 sm:$0xff]   ;;  %s879_s27 = sshll.u32 %s1227_s19, 7  ;;  %s241_s30 = scalar_lea.vmem [#allocation8], %s840_s25 }
  0x75   : > { %348 = vmatprep.subr.bf16.mxu0 %v961_v7  ;;  %585 = vmatpush1.bf16.msra.mxu1 %v981_v22  ;;  %v1397_v17 = vld [vmem:[%s1469_s3] sm:$0xff]  ;;  %s743_s5 = sshll.u32 %s241_s30, 4  ;;  %s1422_s10 = scalar_lea.hbm %s1470_s4, %s879_s27  ;;  %s1424_s5 = int_to_ptr.vmem [resolvable:$true] %s743_s5 }
  0x76   : > { %586 = vmatprep.subr.bf16.mxu1 %v982_v23  ;;  %s730_s24 = scalar_lea.sflag [#allocation4], %s1375_s29  ;;  %s1102_s20 = scalar_lea.vmem %s1424_s5, 128 }
  0x77   : > { %p1103_p11 = scmp.ne.s32.totalorder %s1424_s5, %s1102_s20  ;;  %p1484_p0 = scmp.ne.s32.totalorder %s1479_s13, 0 }
  0x78   : > { %349 = vmatpush1.bf16.msra.mxu0 %v963_v8  ;;  %s1180_s19 = smov [#allocation8]  }
  0x79   : > { %350 = vmatprep.subr.bf16.mxu0 %v964_v9  ;;  %587 = vmatpush1.bf16.msra.mxu1 %v984_v24  ;;  %p1104_p1 = pnand %p1103_p11, %p1484_p0  ;;  %s1106_s28 = sshll.u32 %s1180_s19, 4  ;;  %s1107_s28 = int_to_ptr.vmem [resolvable:$false] %s1106_s28 }
  0x7a   : > { %588 = vmatprep.subr.bf16.mxu1 %v985_v25  ;;  %s1108_s11 = scalar_lea.vmem %s1107_s28, 256  ;;  %p1109_p7 = scmp.lt.s32.totalorder %s1424_s5, %s1107_s28 }
  0x7b   : > { %p1105_p3 = pneg %p1104_p1  ;;  %p1110_p9 = scmp.lt.s32.totalorder %s1108_s11, %s1102_s20 }
  0x7c   : > { %351 = vmatpush1.bf16.msra.mxu0 %v966_v10 }
  0x7d   : > { %352 = vmatprep.subr.bf16.mxu0 %v967_v11  ;;  %589 = vmatpush1.bf16.msra.mxu1 %v987_v26  ;;  %p1111_p12 = por %p1110_p9, %p1109_p7 }
  0x7e   : > { %590 = vmatprep.subr.bf16.mxu1 %v988_v27 }
  0x7f   : > { %p1112_p2 = pnand %p1111_p12, %p1105_p3 }
  0x80   : > { %353 = vmatpush1.bf16.msra.mxu0 %v969_v12 }
  0x81   : > { %354 = vmatprep.subr.bf16.mxu0 %v970_v13  ;;  %591 = vmatpush1.bf16.msra.mxu1 %v990_v28  ;;  %v429_v13 = vlaneseq }
  0x82   : > { %592 = vmatprep.subr.bf16.mxu1 %v991_v29 }
  0x84   : > { %355 = vmatpush1.bf16.msra.mxu0 %v972_v14  ;;  %v1392_v14 = vshrl.u32 %v429_v13, 7 }
  0x85   : > { %356 = vmatprep.subr.bf16.mxu0 %v973_v15  ;;  %593 = vmatpush1.bf16.msra.mxu1 %v993_v30 }
  0x86   : > { %594 = vmatprep.subr.bf16.mxu1 %v994_v31  ;;  %v431_v19 = vsub.s32 0, %v1392_v14  ;;  %v435_v20 = vsub.s32 4, %v1392_v14 }
  0x88   : > { %357 = vmatpush1.bf16.msra.mxu0 %v975_v16 }
  0x89   : > { %595 = vmatpush1.bf16.msra.mxu1 %v996_v32  ;;  %v460_v32 = vsub.s32 1, %v1392_v14 }
  0x8a   : > { %596 = vmatprep.subr.bf16.mxu1 %v997_v33  ;;  %v464_v33 = vsub.s32 5, %v1392_v14 }
  0x8b   : > { %375 = vmatmul.mubr.bf16.vlgmr.msra.gmra.mrb[0].mxu0 %v261_v18 }
  0x8d   : > { %597 = vmatpush1.bf16.msra.mxu1 %v999_v34 }
 0x15e   : > { %v376_v35 = vpop.f32.mrb[0].mxu0 }
 0x15f   : > { %v383_v36 = vrot.slane %v376_v35, 4  ;;  %v395_v37 = vmul.f32 %v376_v35, %v376_v35  ;;  %v378_v38 = vpop.f32.mrb[1].mxu0 }
 0x160   : > { %v389_v39 = vrot.slane %v378_v38, 4  ;;  %v396_v40 = vmul.f32 %v378_v38, %v378_v38  ;;  %v380_v41 = vpop.f32.mrb[2].mxu0 }
 0x161   : > { %v384_v42 = vadd.f32 %v383_v36, %v376_v35  ;;  %v397_v43 = vrot.slane %v395_v37, 4  ;;  %v381_v44 = vpop.f32.mrb[3].mxu0 }
 0x162   : > { %v390_v45 = vadd.f32 %v389_v39, %v378_v38  ;;  %v403_v46 = vrot.slane %v396_v40, 4 }
 0x163   : > { %v385_v47 = vrot.slane %v384_v42, 2  ;;  %v398_v48 = vadd.f32 %v397_v43, %v395_v37 }
 0x164   : > { %v391_v49 = vrot.slane %v390_v45, 2  ;;  %v404_v50 = vadd.f32 %v403_v46, %v396_v40 }
 0x165   : > { %v386_v51 = vadd.f32 %v385_v47, %v384_v42  ;;  %v399_v52 = vrot.slane %v398_v48, 2 }
 0x166   : > { %v392_v53 = vadd.f32 %v391_v49, %v390_v45  ;;  %v405_v54 = vrot.slane %v404_v50, 2 }
 0x167   : > { %v387_v55 = vrot.slane %v386_v51, 1  ;;  %v400_v56 = vadd.f32 %v399_v52, %v398_v48 }
 0x168   : > { %v393_v57 = vrot.slane %v392_v53, 1  ;;  %v406_v58 = vadd.f32 %v405_v54, %v404_v50 }
 0x169   : > { %v388_v59 = vadd.f32 %v387_v55, %v386_v51  ;;  %v401_v60 = vrot.slane %v400_v56, 1 }
 0x16a   : > { %v394_v61 = vadd.f32 %v393_v57, %v392_v53  ;;  %v407_v62 = vrot.slane %v406_v58, 1 }
 0x16b   : > { %v402_v63 = vadd.f32 %v401_v60, %v400_v56  ;;  %v409_v0 = vmul.f32 0.125, %v388_v59 }
 0x16c   : > { %v408_v1 = vadd.f32 %v407_v62, %v406_v58  ;;  %v410_v2 = vmul.f32 0.125, %v394_v61 }
 0x16d   : > { %v411_v3 = vmul.f32 0.125, %v402_v63  ;;  %v413_v4 = vmul.f32 %v409_v0, %v409_v0 }
 0x16e   : > { %v412_v5 = vmul.f32 0.125, %v408_v1  ;;  %v414_v6 = vmul.f32 %v410_v2, %v410_v2 }
 0x16f   : > { %v415_v7 = vsub.f32 %v411_v3, %v413_v4 }
 0x170   : > { %v416_v8 = vsub.f32 %v412_v5, %v414_v6 }
 0x171   : > { %v417_v9 = vmax.f32 %v415_v7, 0.0 }
 0x172   : > { %v418_v10 = vmax.f32 %v416_v8, 0.0 }
 0x173   : > { %v419_v11 = vadd.f32 1e-05, %v417_v9 }
 0x174   : > { %v420_v12 = vadd.f32 1e-05, %v418_v10 }
 0x175   : > { %1000 = vrsqrt.f32 %v419_v11 }
 0x176   : > { %1002 = vrsqrt.f32 %v420_v12 }
 0x17f   : > { %v1001_v15 = vpop.eup %1000 }
 0x180   : > { %v1003_v16 = vpop.eup %1002 }
 0x181   : > { %v425_v18 = vcombine.low %v1001_v15, %v1003_v16 }
 0x183   : > { %v427_v21 = vmul.f32 %v425_v18, %v1397_v17 }
 0x185   : > { %v432_v22 = vrot.slane %v427_v21, %v431_v19  ;;  %v436_v23 = vrot.slane %v427_v21, %v435_v20 }
 0x187   : > { %v439_v24 = vmul.f32 %v432_v22, %v409_v0  ;;  %v440_v25 = vmul.f32 %v436_v23, %v410_v2  ;;  %v454_v26 = vrot.slane %v436_v23, %v431_v19  ;;  %v450_v27 = vrot.slane %v432_v22, %v431_v19 }
 0x189   : > { %v443_v28 = vcombine.low %v439_v24, %v440_v25  ;;  %v456_v29 = vmul.f32 %v454_v26, %v378_v38  ;;  %v455_v30 = vmul.f32 %v450_v27, %v376_v35 }
 0x18b   : > { %v444_v31 = vrot.slane %v443_v28, 7 }
 0x18d   : > { %v446_v34 = vsub.f32 %v1397_v17, %v444_v31  ;;  %v672_v31 = vsub.s32 2, %v1392_v14 }
 0x18f   : > { %v465_v36 = vrot.slane %v446_v34, %v464_v33  ;;  %v461_v37 = vrot.slane %v446_v34, %v460_v32 }
 0x191   : > { %v475_v39 = vrot.slane %v465_v36, %v460_v32  ;;  %v471_v40 = vrot.slane %v461_v37, %v460_v32  ;;  %v676_v32 = vsub.s32 6, %v1392_v14 }
 0x193   : > { %v477_v41 = vadd.f32 %v475_v39, %v456_v29  ;;  %v476_v42 = vadd.f32 %v471_v40, %v455_v30 }
 0x195   : > { %v860_v43 = vmul.f32 -1.442695, %v477_v41 }
 0x197   : > { %1004 = vpow2.f32 %v860_v43 }
 0x1a1   : > { %v1005_v44 = vpop.eup %1004 }
 0x1a2   : > { %v481_v45 = vadd.f32 1.0, %v1005_v44 }
 0x1a4   : > { %1006 = vrcp.f32 %v481_v45 }
 0x1ae   : > { %v1007_v38 = vpop.eup %1006 }
 0x1af   : > { %v1405_v35 = vmul.f32 %v1007_v38, %v476_v42  ;;  %v701_v38 = vsub.s32 3, %v1392_v14 }
 0x1b1   : > { %v501_v46 = vpack.c.bf16 %v1405_v35, %v1405_v35 }
 0x1b3   : > { %615 = vmatmul.mubr.bf16.vlgmr.msra.gmra.mrb[0].mxu1 %v501_v46  ;;  %v705_v46 = vsub.s32 7, %v1392_v14 }
 0x286   : > { %v616_v47 = vpop.f32.mrb[0].mxu1 }
 0x287   : > { %v623_v48 = vrot.slane %v616_v47, 4  ;;  %v635_v49 = vmul.f32 %v616_v47, %v616_v47  ;;  %v618_v50 = vpop.f32.mrb[1].mxu1 }
 0x288   : > { %v629_v51 = vrot.slane %v618_v50, 4  ;;  %v636_v52 = vmul.f32 %v618_v50, %v618_v50  ;;  %v620_v53 = vpop.f32.mrb[2].mxu1 }
 0x289   : > { %v624_v54 = vadd.f32 %v623_v48, %v616_v47  ;;  %v637_v55 = vrot.slane %v635_v49, 4  ;;  %v621_v56 = vpop.f32.mrb[3].mxu1 }
 0x28a   : > { %v630_v57 = vadd.f32 %v629_v51, %v618_v50  ;;  %v643_v58 = vrot.slane %v636_v52, 4 }
 0x28b   : > { %v625_v59 = vrot.slane %v624_v54, 2  ;;  %v638_v60 = vadd.f32 %v637_v55, %v635_v49 }
 0x28c   : > { %v631_v61 = vrot.slane %v630_v57, 2  ;;  %v644_v62 = vadd.f32 %v643_v58, %v636_v52 }
 0x28d   : > { %v626_v63 = vadd.f32 %v625_v59, %v624_v54  ;;  %v639_v0 = vrot.slane %v638_v60, 2 }
 0x28e   : > { %v632_v1 = vadd.f32 %v631_v61, %v630_v57  ;;  %v645_v2 = vrot.slane %v644_v62, 2 }
 0x28f   : > { %v627_v3 = vrot.slane %v626_v63, 1  ;;  %v640_v4 = vadd.f32 %v639_v0, %v638_v60 }
 0x290   : > { %v633_v5 = vrot.slane %v632_v1, 1  ;;  %v646_v6 = vadd.f32 %v645_v2, %v644_v62 }
 0x291   : > { %v628_v7 = vadd.f32 %v627_v3, %v626_v63  ;;  %v641_v8 = vrot.slane %v640_v4, 1 }
 0x292   : > { %v634_v9 = vadd.f32 %v633_v5, %v632_v1  ;;  %v647_v10 = vrot.slane %v646_v6, 1 }
 0x293   : > { %v642_v11 = vadd.f32 %v641_v8, %v640_v4  ;;  %v649_v12 = vmul.f32 0.125, %v628_v7 }
 0x294   : > { %v648_v13 = vadd.f32 %v647_v10, %v646_v6  ;;  %v650_v15 = vmul.f32 0.125, %v634_v9 }
 0x295   : > { %v651_v16 = vmul.f32 0.125, %v642_v11  ;;  %v653_v18 = vmul.f32 %v649_v12, %v649_v12 }
 0x296   : > { %v652_v19 = vmul.f32 0.125, %v648_v13  ;;  %v654_v20 = vmul.f32 %v650_v15, %v650_v15 }
 0x297   : > { %v655_v21 = vsub.f32 %v651_v16, %v653_v18 }
 0x298   : > { %v656_v22 = vsub.f32 %v652_v19, %v654_v20 }
 0x299   : > { %v657_v23 = vmax.f32 %v655_v21, 0.0 }
 0x29a   : > { %v658_v24 = vmax.f32 %v656_v22, 0.0 }
 0x29b   : > { %v659_v25 = vadd.f32 1e-05, %v657_v23 }
 0x29c   : > { %v660_v26 = vadd.f32 1e-05, %v658_v24 }
 0x29d   : > { %1008 = vrsqrt.f32 %v659_v25 }
 0x29e   : > { %1010 = vrsqrt.f32 %v660_v26 }
 0x2a7   : > { %v1009_v27 = vpop.eup %1008 }
 0x2a8   : > { %v1011_v28 = vpop.eup %1010 }
 0x2a9   : > { %v665_v29 = vcombine.low %v1009_v27, %v1011_v28 }
 0x2ab   : > { %v666_v30 = vrot.slane %v665_v29, 6 }
 0x2ad   : > { %v668_v33 = vmul.f32 %v666_v30, %v1397_v17 }
 0x2af   : > { %v673_v34 = vrot.slane %v668_v33, %v672_v31  ;;  %v677_v36 = vrot.slane %v668_v33, %v676_v32 }
 0x2b1   : > { %v680_v37 = vmul.f32 %v673_v34, %v649_v12  ;;  %v681_v39 = vmul.f32 %v677_v36, %v650_v15  ;;  %v691_v40 = vrot.slane %v673_v34, %v672_v31  ;;  %v695_v41 = vrot.slane %v677_v36, %v672_v31 }
 0x2b3   : > { %v684_v42 = vcombine.low %v680_v37, %v681_v39  ;;  %v697_v43 = vmul.f32 %v695_v41, %v618_v50  ;;  %v696_v44 = vmul.f32 %v691_v40, %v616_v47 }
 0x2b5   : > { %v685_v45 = vrot.slane %v684_v42, 5 }
 0x2b7   : > { %v687_v48 = vsub.f32 %v1397_v17, %v685_v45 }
 0x2b9   : > { %v702_v49 = vrot.slane %v687_v48, %v701_v38  ;;  %v706_v51 = vrot.slane %v687_v48, %v705_v46 }
 0x2bb   : > { %v716_v52 = vrot.slane %v706_v51, %v701_v38  ;;  %v712_v53 = vrot.slane %v702_v49, %v701_v38 }
 0x2bd   : > { %v718_v54 = vadd.f32 %v716_v52, %v697_v43  ;;  %v717_v55 = vadd.f32 %v712_v53, %v696_v44 }
 0x2bf   : > { %v877_v56 = vmul.f32 -1.442695, %v718_v54 }
 0x2c1   : > { %1012 = vpow2.f32 %v877_v56 }
 0x2cb   : > { %v1013_v50 = vpop.eup %1012 }
 0x2cc   : > { %v722_v47 = vadd.f32 1.0, %v1013_v50 }
 0x2ce   : > { %1014 = vrcp.f32 %v722_v47 }
 0x2d8   : > { %v1015_v57 = vpop.eup %1014 }
 0x2d9   : > { %v725_v58 = vmul.f32 %v1015_v57, %v717_v55 }
 0x2db   : > { %v726_v14 = vadd.f32 %v725_v58, %v1405_v35 }
 0x2dd   : > { %v727_v17 = vmul.f32 0.70710677, %v726_v14 }
 0x2df   : > { %728 = vst [vmem:[%s241_s30] sm:$0xff] %v727_v17 }
 0x2e0   : > { %1115 = shalt.err (!%p1112_p2)
}
 0x2e1   : > { %s1116_s12 = scalar_lea.hbm %s1422_s10, 128  ;;  %s1120_s7 = scalar_lea.hbm %s1470_s4, 256 }
 0x2e2   : > { %p1117_p13 = scmp.ne.s32.totalorder %s1422_s10, %s1116_s12  ;;  %p1121_p4 = scmp.lt.u32.totalorder %s1422_s10, %s1470_s4 }
 0x2e3   : > { %p1122_p5 = scmp.lt.u32.totalorder %s1120_s7, %s1116_s12  ;;  %p1124_p11 = scmp.lt.u32.totalorder %s1116_s12, %s1422_s10 }
 0x2e4   : > { %p1118_p6 = pnand %p1117_p13, %p1484_p0 }
 0x2e5   : > { %p1123_p8 = por %p1122_p5, %p1121_p4 }
 0x2e6   : > { %p1119_p10 = pneg %p1118_p6 }
 0x2e7   : > { %p1125_p1 = por %p1124_p11, %p1123_p8 }
 0x2e9   : > { %p1126_p3 = pnand %p1125_p1, %p1119_p10 }
 0x2eb   : > { %1129 = shalt.err (!%p1126_p3)
}
 0x2ec   : > { %892 = dma.vmem_to_hbm [thread:$0]  (%p1484_p0), %s1424_s5, 128, %s1422_s10, %s730_s24  }
 0x2ed PF: > { %s755_s23 = sand.u32 1, %s1160_s15   ;;  %p1485_p7 = scmp.ne.s32.totalorder %s1475_s22, 0 }
 0x2ee   : > { %p1486_p9 = scmp.ge.s32.totalorder %s1172_s18, 2  ;;  %s756_s27 = scalar_lea.sflag [#allocation4], %s755_s23 }
 0x2f0   : > { %p906_p12 = pnand %p1486_p9, %p1485_p7 }
 0x2f2   : > { %1155 = dma.done.wait (!%p906_p12), %s756_s27, 128  }
 0x2f3   : > { %1157 = vsyncadd (!%p906_p12), %s756_s27, 4294967168  ;;  %p18_p2 = scmp.ge.s32.totalorder %s1316_s9, 4   ;;  %s1487_s15 = smov %s1164_s16 }
 0x2f4   : > { %s1488_s16 = smov %s1168_s17  ;;  %s1489_s17 = smov %s1332_s14 }
 0x2f5   : > { %s1490_s18 = smov %s1316_s9  ;;  %20 = sbr.rel (!%p18_p2) target bundleno = 6 (0x6), region = 89 }
 0x2fc   :  { %761 = vsyncpa [#allocation3], 1 }
 0x2fd   :  { %763 = vsyncpa [#allocation3 + $0x1], 1 }
 0x2fe   :  { %764 = vsyncpa [#allocation6], 1 }
 0x2ff   :  { %765 = vsyncpa [#allocation4], 1 }
 0x300   :  { %767 = vsyncpa [#allocation4 + $0x1], 1 }

</bundles_post_ra>
